<compile_context>
chip_gen: v6e
topology: v6e:2x2x1
jax: 0.10.0
libtpu: 0.0.40
codegen_flags: <defaults>
</compile_context>

<pallas_src>
import jax
import jax.numpy as jnp
from jax.experimental import pallas as pl
from jax.experimental.pallas import tpu as pltpu


def _round_up(x, m):
    return (x + m - 1) // m * m


def _sublane_min(dtype):
    # Minimum second-to-last tile dim per dtype packing: f32->8, bf16->16, i8/fp8->32.
    return {4: 8, 2: 16, 1: 32}.get(jnp.dtype(dtype).itemsize, 8)


def _default_vmem_table_budget_bytes():
    """Generation-aware budget for keeping the embedding table VMEM-resident."""
    cap = None
    try:
        cap = getattr(pltpu.get_tpu_info(), "vmem_capacity_bytes", None)
    except Exception:
        cap = None
    if not cap:
        cap = 64 << 20  # conservative default: v7x per-TensorCore VMEM
    # Table is single-buffered (unblocked VMEM operand); keep ~25% headroom for
    # the double-buffered output blocks, ids blocks and compiler scratch.
    # -> ~48 MiB on v7x (64 MiB VMEM), ~96 MiB on v5e/v6e (128 MiB VMEM).
    return int(cap) * 3 // 4


# ---------------------------------------------------------------------------
# Kernel A (primary): one-hot MXU gather, table resident in VMEM (1 buffer).
# ---------------------------------------------------------------------------
def _embed_onehot_kernel(ids_ref, table_ref, out_ref):
    # ids_ref:   (TB, 1) int32 VMEM block.
    # table_ref: (n_classes, D) whole table, unblocked VMEM operand (resident once).
    # out_ref:   (TB, D) output block.
    tb = out_ref.shape[0]
    n_classes = table_ref.shape[0]
    cls_iota = jax.lax.broadcasted_iota(jnp.int32, (tb, n_classes), 1)
    onehot = (cls_iota == ids_ref[...]).astype(table_ref.dtype)   # (TB, n_classes)
    out_ref[...] = jnp.dot(
        onehot, table_ref[...], preferred_element_type=jnp.float32
    ).astype(out_ref.dtype)


# ---------------------------------------------------------------------------
# Kernel B: per-row gather with DIRECT per-row stores (no concat), VMEM table.
# ---------------------------------------------------------------------------
def _embed_rowgather_kernel(ids_ref, table_ref, out_ref):
    # ids_ref:   (B_pad,) int32 scalar-prefetch ref (SMEM).
    # table_ref: (n_classes, D) whole table, unblocked VMEM operand.
    # out_ref:   (TB, D) output block.
    tb = out_ref.shape[0]
    base = pl.program_id(0) * tb
    for i in range(tb):                       # TB small & static -> unrolled
        row_id = ids_ref[base + i]
        out_ref[pl.ds(i, 1), :] = table_ref[pl.ds(row_id, 1), :]


# ---------------------------------------------------------------------------
# Kernel C (fallback): table stays in HBM; TB concurrent row DMAs land
# directly in the output block (no scratch copy).
# ---------------------------------------------------------------------------
def _embed_hbm_gather_kernel(ids_ref, table_hbm_ref, out_ref, copy_sems):
    # ids_ref:       (B_pad,) int32 scalar-prefetch ref (SMEM).
    # table_hbm_ref: (n_classes, D) raw HBM ref (memory_space=pl.ANY).
    # out_ref:       (TB, D) output block (DMA destination).
    # copy_sems:     (TB,) DMA semaphores (one per in-flight row copy).
    tb = out_ref.shape[0]
    base = pl.program_id(0) * tb
    copies = []
    for i in range(tb):                       # issue all fetches -> latencies overlap
        row_id = ids_ref[base + i]
        cp = pltpu.make_async_copy(
            table_hbm_ref.at[pl.ds(row_id, 1), :],
            out_ref.at[pl.ds(i, 1), :],
            copy_sems.at[i],
        )
        cp.start()
        copies.append(cp)
    for cp in copies:                         # wait on the ORIGINAL descriptors
        cp.wait()


# ---------------------------------------------------------------------------
# Gather wrapper: picks the one-hot / row-gather / HBM-gather strategy.
# ---------------------------------------------------------------------------
def embedding_gather(class_ids, embedding_table, *,
                     vmem_table_budget_bytes=None,
                     onehot_max_classes=4096):
    """class_ids: (B,) int, embedding_table: (n_classes, D) -> (B, D)."""
    B = int(class_ids.shape[0])
    n_classes, D = embedding_table.shape
    dtype = embedding_table.dtype
    itemsize = jnp.dtype(dtype).itemsize
    table_bytes = n_classes * D * itemsize

    if vmem_table_budget_bytes is None:
        vmem_table_budget_bytes = _default_vmem_table_budget_bytes()

    table_in_vmem = table_bytes <= vmem_table_budget_bytes
    use_onehot = table_in_vmem and (n_classes <= onehot_max_classes)

    # Batch tile: dtype-correct sublane multiple, big enough that small/medium
    # batches run in a single grid step (~0.35 us fixed cost per step).
    sub = _sublane_min(dtype)
    if use_onehot:
        tb_cap = 256
    elif table_in_vmem:
        tb_cap = 64            # unrolled per-row gather: bound code size
    else:
        tb_cap = 128           # HBM fallback: many concurrent row DMAs per step
    TB = min(_round_up(max(B, 1), sub), max(tb_cap, sub))
    B_pad = _round_up(max(B, 1), TB)

    ids = class_ids.astype(jnp.int32)
    if B_pad != B:
        ids = jnp.pad(ids, (0, B_pad - B))    # padded slots gather row 0; sliced off
    grid = (B_pad // TB,)
    # Only split across TensorCores when there is real multi-step work.
    dim_sem = ("parallel",) if grid[0] > 1 else ("arbitrary",)

    out_block_bytes = TB * D * itemsize

    if use_onehot:
        # --- VMEM-resident table, one-hot MXU gather ---
        onehot_bytes = TB * _round_up(n_classes, 128) * 4
        vmem_limit = max(table_bytes + 2 * out_block_bytes + onehot_bytes + (8 << 20),
                         32 << 20)
        out = pl.pallas_call(
            _embed_onehot_kernel,
            out_shape=jax.ShapeDtypeStruct((B_pad, D), dtype),
            grid=grid,
            in_specs=[
                pl.BlockSpec((TB, 1), lambda i: (i, 0)),
                # Whole table, unblocked, resident in VMEM (single buffer).
                pl.BlockSpec(memory_space=pltpu.MemorySpace.VMEM),
            ],
            out_specs=pl.BlockSpec((TB, D), lambda i: (i, 0)),
            compiler_params=pltpu.CompilerParams(
                dimension_semantics=dim_sem,
                vmem_limit_bytes=vmem_limit),
        )(ids.reshape(B_pad, 1), embedding_table)
    elif table_in_vmem:
        # --- VMEM-resident table, direct per-row stores ---
        vmem_limit = max(table_bytes + 2 * out_block_bytes + (8 << 20), 32 << 20)
        out = pl.pallas_call(
            _embed_rowgather_kernel,
            out_shape=jax.ShapeDtypeStruct((B_pad, D), dtype),
            grid_spec=pltpu.PrefetchScalarGridSpec(
                num_scalar_prefetch=1,
                grid=grid,
                in_specs=[pl.BlockSpec(memory_space=pltpu.MemorySpace.VMEM)],
                out_specs=pl.BlockSpec((TB, D), lambda i, ids_ref: (i, 0)),
            ),
            compiler_params=pltpu.CompilerParams(
                dimension_semantics=dim_sem,
                vmem_limit_bytes=vmem_limit),
        )(ids, embedding_table)
    else:
        # --- HBM row-DMA fallback (table too large for VMEM) ---
        # TODO(synk): cross-step prefetch (double-buffered landing area + sems)
        # would hide the per-step HBM row-fetch latency for multi-tile batches.
        out = pl.pallas_call(
            _embed_hbm_gather_kernel,
            out_shape=jax.ShapeDtypeStruct((B_pad, D), dtype),
            grid_spec=pltpu.PrefetchScalarGridSpec(
                num_scalar_prefetch=1,
                grid=grid,
                in_specs=[pl.BlockSpec(memory_space=pl.ANY)],   # raw HBM, manual DMA
                out_specs=pl.BlockSpec((TB, D), lambda i, ids_ref: (i, 0)),
                scratch_shapes=[pltpu.SemaphoreType.DMA((TB,))],
            ),
            compiler_params=pltpu.CompilerParams(
                dimension_semantics=dim_sem),
        )(ids, embedding_table)

    return out[:B]


# ---------------------------------------------------------------------------
# ClassEmbedder forward (wrapper / glue)
# ---------------------------------------------------------------------------
def class_embedder_forward(batch, embedding_table, *, key='class', n_classes=1000,
                           ucg_rate=0.1, disable_dropout=False, dropout_rng=None,
                           vmem_table_budget_bytes=None, onehot_max_classes=4096):
    c = batch[key]                                       # (B,) integer class labels
    if ucg_rate > 0.0 and not disable_dropout:
        if dropout_rng is None:
            raise ValueError(
                "dropout_rng must be provided when ucg_rate > 0 and dropout is enabled")
        # torch: mask = 1 - bernoulli(ones*rate); c = mask*c + (1-mask)*(n_classes-1)
        drop = jax.random.bernoulli(dropout_rng, p=ucg_rate, shape=c.shape)
        c = jnp.where(drop, n_classes - 1, c)
    # Clamp so out-of-range ids can never drive an OOB table-row fetch.
    c = jnp.clip(c.astype(jnp.int32), 0, n_classes - 1)
    emb = embedding_gather(c, embedding_table,
                           vmem_table_budget_bytes=vmem_table_budget_bytes,
                           onehot_max_classes=onehot_max_classes)    # (B, D)
    return emb[:, None, :]                               # (B, 1, D) — torch's [:, None]


# ---------------------------------------------------------------------------
# Demo / self-check
# ---------------------------------------------------------------------------
if __name__ == "__main__":
    embed_dim = 128
    n_classes = 1000
    B = 4

    root = jax.random.PRNGKey(0)
    k_emb, k_cls, k_drop = jax.random.split(root, 3)

    # Deterministic "nn.Embedding(n_classes, embed_dim)" weights (synthetic init).
    embedding_table = jax.random.normal(k_emb, (n_classes, embed_dim), dtype=jnp.float32)
    class_ids = jax.random.randint(k_cls, (B,), 0, n_classes, dtype=jnp.int32)
    batch = {"class": class_ids}

    ref = embedding_table[class_ids][:, None, :]

    # 1) Full forward with UCG dropout enabled (exercises the complete path).
    out_drop = class_embedder_forward(
        batch, embedding_table, key="class", n_classes=n_classes,
        ucg_rate=0.1, disable_dropout=False, dropout_rng=k_drop)
    out_drop = jax.block_until_ready(out_drop)
    assert out_drop.shape == (B, 1, embed_dim)
    assert out_drop.dtype == jnp.float32

    # 2) Dropout disabled -> primary one-hot MXU path (tolerance covers MXU
    #    f32-matmul precision modes; values are exact on full-precision MXU).
    out_onehot = class_embedder_forward(
        batch, embedding_table, key="class", n_classes=n_classes,
        ucg_rate=0.1, disable_dropout=True, dropout_rng=k_drop)
    out_onehot = jax.block_until_ready(out_onehot)
    assert jnp.allclose(out_onehot, ref, rtol=3e-3, atol=3e-3), \
        "one-hot MXU gather mismatch vs reference"

    # 3) Force the per-row VMEM gather path (direct stores); exact check.
    out_rows = class_embedder_forward(
        batch, embedding_table, key="class", n_classes=n_classes,
        ucg_rate=0.1, disable_dropout=True, dropout_rng=k_drop,
        onehot_max_classes=0)
    out_rows = jax.block_until_ready(out_rows)
    assert jnp.array_equal(out_rows, ref), "row-gather (VMEM table) mismatch vs reference"

    # 4) Force the HBM row-DMA fallback (tiny VMEM budget); exact check.
    out_hbm = class_embedder_forward(
        batch, embedding_table, key="class", n_classes=n_classes,
        ucg_rate=0.1, disable_dropout=True, dropout_rng=k_drop,
        vmem_table_budget_bytes=0)
    out_hbm = jax.block_until_ready(out_hbm)
    assert jnp.array_equal(out_hbm, ref), "HBM row-DMA fallback mismatch vs reference"

    print("KERNEL_OK")
</pallas_src>

<mosaic_0001>
module attributes {stable_mosaic.version = 11 : i64} {
  func.func @_embed_onehot_kernel(%arg0: i32, %arg1: memref<8x1xi32, #tpu.memory_space<vmem>>, %arg2: memref<1000x128xf32, #tpu.memory_space<vmem>>, %arg3: memref<8x128xf32, #tpu.memory_space<vmem>>) attributes {dimension_semantics = [#tpu.dimension_semantics<arbitrary>], iteration_bounds = array<i64: 1>, scalar_prefetch = 0 : i64, scratch_operands = 0 : i64, tpu.core_type = #tpu.core_type<tc>, window_params = [{transform_indices = @transform_0, window_bounds = array<i64: 8, 1>}, {pipeline_mode = #tpu.pipeline_mode<synchronous>, transform_indices = @transform_1, window_bounds = array<i64: 1000, 128>}, {transform_indices = @transform_2, window_bounds = array<i64: 8, 128>}]} {
    %0 = tpu.iota {dimensions = array<i32: 1>} : vector<8x1000xi32>
    %c0 = arith.constant 0 : index
    %c0_0 = arith.constant 0 : index
    %1 = vector.load %arg1[%c0, %c0_0] : memref<8x1xi32, #tpu.memory_space<vmem>>, vector<8x1xi32>
    %2 = vector.broadcast %1 : vector<8x1xi32> to vector<8x1000xi32>
    %3 = arith.cmpi eq, %0, %2 : vector<8x1000xi32>
    %4 = arith.extui %3 : vector<8x1000xi1> to vector<8x1000xi32>
    %5 = arith.sitofp %4 : vector<8x1000xi32> to vector<8x1000xf32>
    %c0_1 = arith.constant 0 : index
    %c0_2 = arith.constant 0 : index
    %6 = vector.load %arg2[%c0_1, %c0_2] : memref<1000x128xf32, #tpu.memory_space<vmem>>, vector<1000x128xf32>
    %cst = arith.constant dense<0.000000e+00> : vector<8x128xf32>
    %7 = tpu.matmul %5, %6, %cst {dimension_numbers = #tpu.dot_dimension_numbers<[1], [0], [0], [1], [0, 0, 1, 1], [], []>} : vector<8x1000xf32>, vector<1000x128xf32>, vector<8x128xf32> -> vector<8x128xf32>
    %c0_3 = arith.constant 0 : index
    %c0_4 = arith.constant 0 : index
    %8 = vector.load %arg3[%c0_3, %c0_4] : memref<8x128xf32, #tpu.memory_space<vmem>>, vector<8x128xf32>
    tpu.vector_store %arg3[%c0_3, %c0_4], %7 {strides = array<i32>} : memref<8x128xf32, #tpu.memory_space<vmem>>, vector<8x128xf32>,
    return
  }
  func.func @transform_0(%arg0: i32) -> (i32, i32) {
    %c0_i32 = arith.constant 0 : i32
    %c0_i32_0 = arith.constant 0 : i32
    return %arg0, %c0_i32 : i32, i32
  }
  func.func @transform_1(%arg0: i32) -> (i32, i32) {
    %c0_i32 = arith.constant 0 : i32
    %c0_i32_0 = arith.constant 0 : i32
    %c0_i32_1 = arith.constant 0 : i32
    return %c0_i32, %c0_i32_0 : i32, i32
  }
  func.func @transform_2(%arg0: i32) -> (i32, i32) {
    %c0_i32 = arith.constant 0 : i32
    %c0_i32_0 = arith.constant 0 : i32
    return %arg0, %c0_i32 : i32, i32
  }
}

</mosaic_0001>

<bundles_post_ra>
// kernel: tpu_custom_call.1
= control target key start
LH: loop header
LB: loop body
LE: loop exit
PB: predicated region body
PF: predicated region fallthrough
CT: control target
= control target key end

     0   :  { %7 = vsyncpa [#allocation3], 0  ;;  %s749_s0 = inlined_call_operand.vmem [shape: s32[8,1], index: 0, kind: input, shape index: {}]   ;;  %s750_s1 = inlined_call_operand.hbm [shape: f32[1000,128], index: 1, kind: input, shape index: {}]   ;;  %s751_s2 = inlined_call_operand.hbm [shape: f32[8,128], index: 2, kind: output, shape index: {}]  }
   0x1   :  { %8 = vsyncpa [#allocation4], 0  ;;  %s661_s9 = smov [#allocation2]  }
   0x2   :  { %s16_s10 = sshll.u32 %s661_s9, 4  ;;  %s17_s10 = int_to_ptr.vmem [resolvable:$true] %s16_s10 }
   0x3   :  { %s625_s11 = scalar_lea.vmem %s17_s10, 16000  ;;  %p630_p1 = scmp.lt.s32.totalorder %s17_s10, %s17_s10 }
   0x4   :  { %p626_p0 = scmp.ne.s32.totalorder %s17_s10, %s625_s11  ;;  %p631_p2 = scmp.lt.s32.totalorder %s625_s11, %s625_s11 }
   0x6   :  { %p632_p3 = por %p631_p2, %p630_p1 }
   0x8   :  { %p633_p4 = pnand %p632_p3, %p626_p0 }
   0xa   :  { %636 = shalt.err (!%p633_p4)
}
   0xb   :  { %s662_s12 = smov 128   ;;  %s663_s13 = smov 8  }
   0xc   :  { %22 = dma.hbm_to_vmem [thread:$0]  %s750_s1, 16000, %s17_s10, [#allocation3], %s662_s12, %s662_s12, %s663_s13  }
   0xd   :  { %657 = dma.done.wait [#allocation3], 16000  }
   0xe   :  { %658 = vsyncadd [#allocation3], 4294951296  ;;  %v664_v0 = vmov 0   ;;  %v35_v1 = vld [vmem:[%s749_s0] sm:$0xff]  ;;  %v94_v2 = vld [vmem:[#allocation2 + $0xf8] sm:$0xff]  ;;  %vm188_vm5 = vcmask 850944  }
   0xf   :  { %616 = vset.pattern.permute.xlu0 %v664_v0  ;;  %v126_v3 = vld [vmem:[#allocation2 + $0x1f8] sm:$0xff]  ;;  %504 = vmatprep.subr.mxu0 %v94_v2  ;;  %v93_v6 = vld [vmem:[#allocation2 + $0xf0] sm:$0xff]  ;;  %v92_v10 = vld [vmem:[#allocation2 + $0xe8] sm:$0xff]  ;;  %s667_s0 = smov [#allocation5]  }
  0x10   :  { %37 = vperm.xlu0 %616, %v35_v1   ;;  %v78_v4 = vld [vmem:[#allocation2 + $0x78] sm:$0xff]  ;;  %539 = vmatprep.subr.mxu1 %v126_v3  ;;  %v125_v7 = vld [vmem:[#allocation2 + $0x1f0] sm:$0xff]  ;;  %v124_v11 = vld [vmem:[#allocation2 + $0x1e8] sm:$0xff]  ;;  %v665_v3 = vmov 0.0   ;;  %s479_s1 = sshll.u32 %s667_s0, 4  ;;  %s480_s1 = int_to_ptr.vmem [resolvable:$true] %s479_s1 }
  0x11   :  { %v110_v5 = vld [vmem:[#allocation2 + $0x178] sm:$0xff]  ;;  %505 = vmatpush3.msra.mxu0 %v78_v4  ;;  %v77_v8 = vld [vmem:[#allocation2 + $0x70] sm:$0xff]  ;;  %v76_v12 = vld [vmem:[#allocation2 + $0x68] sm:$0xff]  ;;  %v26_v4 = vlaneseq  ;;  %s637_s18 = scalar_lea.vmem %s480_s1, 128  ;;  %p642_p6 = scmp.lt.s32.totalorder %s480_s1, %s480_s1 }
  0x12   :  { %v109_v9 = vld [vmem:[#allocation2 + $0x170] sm:$0xff]  ;;  %540 = vmatpush3.msra.mxu1 %v110_v5  ;;  %506 = vmatprep.subr.mxu0 %v93_v6  ;;  %v108_v13 = vld [vmem:[#allocation2 + $0x168] sm:$0xff]  ;;  %v91_v14 = vld [vmem:[#allocation2 + $0xe0] sm:$0xff]  ;;  %p638_p5 = scmp.ne.s32.totalorder %s480_s1, %s637_s18  ;;  %p643_p7 = scmp.lt.s32.totalorder %s637_s18, %s637_s18 }
  0x13   :  { %541 = vmatprep.subr.mxu1 %v125_v7  ;;  %507 = vmatpush3.msra.mxu0 %v77_v8  ;;  %v123_v15 = vld [vmem:[#allocation2 + $0x1e0] sm:$0xff]  ;;  %v90_v18 = vld [vmem:[#allocation2 + $0xd8] sm:$0xff]  ;;  %v89_v22 = vld [vmem:[#allocation2 + $0xd0] sm:$0xff]  ;;  %v690_v5 = vand.u32 127, %v26_v4 }
  0x14   :  { %542 = vmatpush3.msra.mxu1 %v109_v9  ;;  %508 = vmatprep.subr.mxu0 %v92_v10  ;;  %v75_v16 = vld [vmem:[#allocation2 + $0x60] sm:$0xff]  ;;  %v122_v19 = vld [vmem:[#allocation2 + $0x1d8] sm:$0xff]  ;;  %v121_v23 = vld [vmem:[#allocation2 + $0x1d0] sm:$0xff]  ;;  %p644_p8 = por %p643_p7, %p642_p6 }
  0x15   :  { %543 = vmatprep.subr.mxu1 %v124_v11  ;;  %509 = vmatpush3.msra.mxu0 %v76_v12  ;;  %v107_v17 = vld [vmem:[#allocation2 + $0x160] sm:$0xff]  ;;  %v74_v20 = vld [vmem:[#allocation2 + $0x58] sm:$0xff]  ;;  %v73_v24 = vld [vmem:[#allocation2 + $0x50] sm:$0xff]  ;;  %v28_v6 = vadd.s32 128, %v690_v5  ;;  %v30_v7 = vadd.s32 384, %v690_v5  ;;  %v29_v8 = vadd.s32 256, %v690_v5 }
  0x16   :  { %544 = vmatpush3.msra.mxu1 %v108_v13  ;;  %510 = vmatprep.subr.mxu0 %v91_v14  ;;  %v106_v21 = vld [vmem:[#allocation2 + $0x158] sm:$0xff]  ;;  %v105_v25 = vld [vmem:[#allocation2 + $0x150] sm:$0xff]  ;;  %v88_v26 = vld [vmem:[#allocation2 + $0xc8] sm:$0xff]  ;;  %v34_v9 = vadd.s32 896, %v690_v5  ;;  %v32_v11 = vadd.s32 640, %v690_v5  ;;  %v666_v14 = vmov 1.0   ;;  %p645_p9 = pnand %p644_p8, %p638_p5 }
  0x17   :  { %545 = vmatprep.subr.mxu1 %v123_v15  ;;  %511 = vmatpush3.msra.mxu0 %v75_v16  ;;  %v120_v27 = vld [vmem:[#allocation2 + $0x1c8] sm:$0xff]  ;;  %v87_v30 = vld [vmem:[#allocation2 + $0xc0] sm:$0xff]  ;;  %v86_v34 = vld [vmem:[#allocation2 + $0xb8] sm:$0xff] }
  0x18   :  { %546 = vmatpush3.msra.mxu1 %v107_v17  ;;  %512 = vmatprep.subr.mxu0 %v90_v18  ;;  %v72_v28 = vld [vmem:[#allocation2 + $0x48] sm:$0xff]  ;;  %v119_v31 = vld [vmem:[#allocation2 + $0x1c0] sm:$0xff]  ;;  %v118_v35 = vld [vmem:[#allocation2 + $0x1b8] sm:$0xff] }
  0x19   :  { %547 = vmatprep.subr.mxu1 %v122_v19  ;;  %513 = vmatpush3.msra.mxu0 %v74_v20  ;;  %v104_v29 = vld [vmem:[#allocation2 + $0x148] sm:$0xff]  ;;  %v71_v32 = vld [vmem:[#allocation2 + $0x40] sm:$0xff]  ;;  %v70_v36 = vld [vmem:[#allocation2 + $0x38] sm:$0xff] }
  0x1a   :  { %548 = vmatpush3.msra.mxu1 %v106_v21  ;;  %514 = vmatprep.subr.mxu0 %v89_v22  ;;  %v103_v33 = vld [vmem:[#allocation2 + $0x140] sm:$0xff]  ;;  %v102_v37 = vld [vmem:[#allocation2 + $0x138] sm:$0xff]  ;;  %v85_v38 = vld [vmem:[#allocation2 + $0xb0] sm:$0xff] }
  0x1b   :  { %549 = vmatprep.subr.mxu1 %v121_v23  ;;  %515 = vmatpush3.msra.mxu0 %v73_v24  ;;  %v117_v39 = vld [vmem:[#allocation2 + $0x1b0] sm:$0xff]  ;;  %v84_v42 = vld [vmem:[#allocation2 + $0xa8] sm:$0xff]  ;;  %v83_v46 = vld [vmem:[#allocation2 + $0xa0] sm:$0xff] }
  0x1c   :  { %550 = vmatpush3.msra.mxu1 %v105_v25  ;;  %516 = vmatprep.subr.mxu0 %v88_v26  ;;  %v69_v40 = vld [vmem:[#allocation2 + $0x30] sm:$0xff]  ;;  %v116_v43 = vld [vmem:[#allocation2 + $0x1a8] sm:$0xff]  ;;  %v115_v47 = vld [vmem:[#allocation2 + $0x1a0] sm:$0xff] }
  0x1d   :  { %551 = vmatprep.subr.mxu1 %v120_v27  ;;  %517 = vmatpush3.msra.mxu0 %v72_v28  ;;  %v101_v41 = vld [vmem:[#allocation2 + $0x130] sm:$0xff]  ;;  %v68_v44 = vld [vmem:[#allocation2 + $0x28] sm:$0xff]  ;;  %v67_v48 = vld [vmem:[#allocation2 + $0x20] sm:$0xff] }
  0x1e   :  { %552 = vmatpush3.msra.mxu1 %v104_v29  ;;  %518 = vmatprep.subr.mxu0 %v87_v30  ;;  %v100_v45 = vld [vmem:[#allocation2 + $0x128] sm:$0xff]  ;;  %v99_v49 = vld [vmem:[#allocation2 + $0x120] sm:$0xff]  ;;  %v82_v50 = vld [vmem:[#allocation2 + $0x98] sm:$0xff] }
  0x1f   :  { %553 = vmatprep.subr.mxu1 %v119_v31  ;;  %519 = vmatpush3.msra.mxu0 %v71_v32  ;;  %v114_v51 = vld [vmem:[#allocation2 + $0x198] sm:$0xff]  ;;  %v81_v54 = vld [vmem:[#allocation2 + $0x90] sm:$0xff]  ;;  %v80_v58 = vld [vmem:[#allocation2 + $0x88] sm:$0xff] }
  0x20   :  { %554 = vmatpush3.msra.mxu1 %v103_v33  ;;  %520 = vmatprep.subr.mxu0 %v86_v34  ;;  %v66_v52 = vld [vmem:[#allocation2 + $0x18] sm:$0xff]  ;;  %v113_v55 = vld [vmem:[#allocation2 + $0x190] sm:$0xff]  ;;  %v112_v59 = vld [vmem:[#allocation2 + $0x188] sm:$0xff] }
  0x21   :  { %555 = vmatprep.subr.mxu1 %v118_v35  ;;  %521 = vmatpush3.msra.mxu0 %v70_v36  ;;  %v98_v53 = vld [vmem:[#allocation2 + $0x118] sm:$0xff]  ;;  %v65_v56 = vld [vmem:[#allocation2 + $0x10] sm:$0xff]  ;;  %v64_v60 = vld [vmem:[#allocation2 + $0x8] sm:$0xff] }
  0x22   :  { %556 = vmatpush3.msra.mxu1 %v102_v37  ;;  %522 = vmatprep.subr.mxu0 %v85_v38  ;;  %v97_v57 = vld [vmem:[#allocation2 + $0x110] sm:$0xff]  ;;  %v96_v61 = vld [vmem:[#allocation2 + $0x108] sm:$0xff]  ;;  %v79_v62 = vld [vmem:[#allocation2 + $0x80] sm:$0xff] }
  0x23   :  { %557 = vmatprep.subr.mxu1 %v117_v39  ;;  %523 = vmatpush3.msra.mxu0 %v69_v40  ;;  %v111_v63 = vld [vmem:[#allocation2 + $0x180] sm:$0xff]  ;;  %v158_v2 = vld [vmem:[#allocation2 + $0x2f8] sm:$0xff]  ;;  %v157_v15 = vld [vmem:[#allocation2 + $0x2f0] sm:$0xff] }
  0x24   :  { %558 = vmatpush3.msra.mxu1 %v101_v41  ;;  %524 = vmatprep.subr.mxu0 %v84_v42  ;;  %v63_v0 = vld [vmem:[#allocation2] sm:$0xff]  ;;  %v142_v12 = vld [vmem:[#allocation2 + $0x278] sm:$0xff]  ;;  %v141_v17 = vld [vmem:[#allocation2 + $0x270] sm:$0xff] }
  0x25   :  { %559 = vmatprep.subr.mxu1 %v116_v43  ;;  %525 = vmatpush3.msra.mxu0 %v68_v44  ;;  %v95_v1 = vld [vmem:[#allocation2 + $0x100] sm:$0xff]  ;;  %v174_v13 = vld [vmem:[#allocation2 + $0x378] sm:$0xff]  ;;  %v173_v18 = vld [vmem:[#allocation2 + $0x370] sm:$0xff] }
  0x26   :  { %560 = vmatpush3.msra.mxu1 %v100_v45  ;;  %526 = vmatprep.subr.mxu0 %v83_v46  ;;  %v156_v19 = vld [vmem:[#allocation2 + $0x2e8] sm:$0xff]  ;;  %v155_v22 = vld [vmem:[#allocation2 + $0x2e0] sm:$0xff]  ;;  %v154_v25 = vld [vmem:[#allocation2 + $0x2d8] sm:$0xff] }
  0x27   :  { %561 = vmatprep.subr.mxu1 %v115_v47  ;;  %527 = vmatpush3.msra.mxu0 %v67_v48  ;;  %v140_v20 = vld [vmem:[#allocation2 + $0x268] sm:$0xff]  ;;  %v139_v23 = vld [vmem:[#allocation2 + $0x260] sm:$0xff]  ;;  %v138_v26 = vld [vmem:[#allocation2 + $0x258] sm:$0xff] }
  0x28   :  { %562 = vmatpush3.msra.mxu1 %v99_v49  ;;  %528 = vmatprep.subr.mxu0 %v82_v50  ;;  %v172_v21 = vld [vmem:[#allocation2 + $0x368] sm:$0xff]  ;;  %v171_v24 = vld [vmem:[#allocation2 + $0x360] sm:$0xff]  ;;  %v170_v27 = vld [vmem:[#allocation2 + $0x358] sm:$0xff] }
  0x29   :  { %563 = vmatprep.subr.mxu1 %v114_v51  ;;  %529 = vmatpush3.msra.mxu0 %v66_v52  ;;  %v153_v28 = vld [vmem:[#allocation2 + $0x2d0] sm:$0xff]  ;;  %v152_v31 = vld [vmem:[#allocation2 + $0x2c8] sm:$0xff]  ;;  %v151_v34 = vld [vmem:[#allocation2 + $0x2c0] sm:$0xff] }
  0x2a   :  { %564 = vmatpush3.msra.mxu1 %v98_v53  ;;  %530 = vmatprep.subr.mxu0 %v81_v54  ;;  %v137_v29 = vld [vmem:[#allocation2 + $0x250] sm:$0xff]  ;;  %v136_v32 = vld [vmem:[#allocation2 + $0x248] sm:$0xff]  ;;  %v135_v35 = vld [vmem:[#allocation2 + $0x240] sm:$0xff] }
  0x2b   :  { %565 = vmatprep.subr.mxu1 %v113_v55  ;;  %531 = vmatpush3.msra.mxu0 %v65_v56  ;;  %v169_v30 = vld [vmem:[#allocation2 + $0x350] sm:$0xff]  ;;  %v168_v33 = vld [vmem:[#allocation2 + $0x348] sm:$0xff]  ;;  %v167_v36 = vld [vmem:[#allocation2 + $0x340] sm:$0xff] }
  0x2c   :  { %566 = vmatpush3.msra.mxu1 %v97_v57  ;;  %532 = vmatprep.subr.mxu0 %v80_v58  ;;  %v150_v37 = vld [vmem:[#allocation2 + $0x2b8] sm:$0xff]  ;;  %v149_v40 = vld [vmem:[#allocation2 + $0x2b0] sm:$0xff]  ;;  %v148_v43 = vld [vmem:[#allocation2 + $0x2a8] sm:$0xff] }
  0x2d   :  { %567 = vmatprep.subr.mxu1 %v112_v59  ;;  %533 = vmatpush3.msra.mxu0 %v64_v60  ;;  %v134_v38 = vld [vmem:[#allocation2 + $0x238] sm:$0xff]  ;;  %v133_v41 = vld [vmem:[#allocation2 + $0x230] sm:$0xff]  ;;  %v132_v44 = vld [vmem:[#allocation2 + $0x228] sm:$0xff]  ;;  %v31_v59 = vadd.s32 512, %v690_v5 }
  0x2e   :  { %568 = vmatpush3.msra.mxu1 %v96_v61  ;;  %534 = vmatprep.subr.mxu0 %v79_v62  ;;  %v166_v39 = vld [vmem:[#allocation2 + $0x338] sm:$0xff]  ;;  %v165_v42 = vld [vmem:[#allocation2 + $0x330] sm:$0xff]  ;;  %v164_v45 = vld [vmem:[#allocation2 + $0x328] sm:$0xff] }
  0x2f   :  { %569 = vmatprep.subr.mxu1 %v111_v63  ;;  %535 = vmatpush3.msra.mxu0 %v63_v0  ;;  %v147_v46 = vld [vmem:[#allocation2 + $0x2a0] sm:$0xff]  ;;  %v146_v49 = vld [vmem:[#allocation2 + $0x298] sm:$0xff]  ;;  %v145_v52 = vld [vmem:[#allocation2 + $0x290] sm:$0xff] }
  0x30   :  { %570 = vmatpush3.msra.mxu1 %v95_v1  ;;  %574 = vmatprep.subr.mxu0 %v158_v2  ;;  %v131_v47 = vld [vmem:[#allocation2 + $0x220] sm:$0xff]  ;;  %v130_v50 = vld [vmem:[#allocation2 + $0x218] sm:$0xff]  ;;  %v129_v53 = vld [vmem:[#allocation2 + $0x210] sm:$0xff] }
  0x31   :  { %402 = vmatprep.subr.mxu1 %v665_v3  ;;  %v163_v48 = vld [vmem:[#allocation2 + $0x320] sm:$0xff]  ;;  %v162_v51 = vld [vmem:[#allocation2 + $0x318] sm:$0xff]  ;;  %v161_v54 = vld [vmem:[#allocation2 + $0x310] sm:$0xff] }
  0x32   :  { %v144_v55 = vld [vmem:[#allocation2 + $0x288] sm:$0xff]  ;;  %v143_v58 = vld [vmem:[#allocation2 + $0x280] sm:$0xff]  ;;  %v186_v63 = vld [vmem:[#allocation2 + $0x3d8] sm:$0xff] }
  0x33   :  { %v128_v56 = vld [vmem:[#allocation2 + $0x208] sm:$0xff]  ;;  %v127_v60 = vld [vmem:[#allocation2 + $0x200] sm:$0xff]  ;;  %v185_v0 = vld [vmem:[#allocation2 + $0x3d0] sm:$0xff] }
  0x34   :  { %v160_v57 = vld [vmem:[#allocation2 + $0x308] sm:$0xff]  ;;  %v159_v61 = vld [vmem:[#allocation2 + $0x300] sm:$0xff]  ;;  %v182_v4 = vld [vmem:[#allocation2 + $0x3b8] sm:$0xff] }
  0x35   :  { %v187_v62 = vld [vmem:[#allocation2 + $0x3e0] sm:$0xff]  ;;  %v184_v1 = vld [vmem:[#allocation2 + $0x3c8] sm:$0xff] }
  0x36   :  { %v183_v2 = vld [vmem:[#allocation2 + $0x3c0] sm:$0xff] }
  0x8b   :  { %v696_v10 = vpop.permute.xlu0 %37 }
  0x8c   :  { %vm40_vm0 = vcmp.eq.s32.totalorder %v28_v6, %v696_v10  ;;  %vm42_vm1 = vcmp.eq.s32.totalorder %v30_v7, %v696_v10  ;;  %vm39_vm2 = vcmp.eq.s32.totalorder %v690_v5, %v696_v10  ;;  %vm41_vm3 = vcmp.eq.s32.totalorder %v29_v8, %v696_v10  ;;  %v181_v6 = vld [vmem:[#allocation2 + $0x3b0] sm:$0xff]  ;;  %v180_v7 = vld [vmem:[#allocation2 + $0x3a8] sm:$0xff]  ;;  %v179_v8 = vld [vmem:[#allocation2 + $0x3a0] sm:$0xff] }
  0x8d   :  { %496 = vmatprep.mubr.msk.f32.mxu0 %vm40_vm0, %v666_v14  ;;  %498 = vmatprep.mubr.msk.f32.mxu1 %vm42_vm1, %v666_v14  ;;  %vm46_vm4 = vcmp.eq.s32.totalorder %v34_v9, %v696_v10  ;;  %vm44_vm6 = vcmp.eq.s32.totalorder %v32_v11, %v696_v10  ;;  %vm43_vm7 = vcmp.eq.s32.totalorder %v31_v59, %v696_v10  ;;  %v178_v9 = vld [vmem:[#allocation2 + $0x398] sm:$0xff]  ;;  %v177_v11 = vld [vmem:[#allocation2 + $0x390] sm:$0xff] }
  0x8e   :  { %497 = vmatmul.mubr.msk.f32.vlgmr.msra.gmra.mxu0 %vm39_vm2, %v666_v14  ;;  %499 = vmatmul.mubr.msk.f32.vlgmr.msra.gmra.mxu1 %vm41_vm3, %v666_v14  ;;  %v495_v16 = vsel %vm46_vm4, 1.0, %v665_v3 }
  0x8f   :  { %575 = vmatpush3.msra.mxu0 %v142_v12  ;;  %403 = vmatpush1.msra.mxu1 %v174_v13  ;;  %v176_v12 = vld [vmem:[#allocation2 + $0x388] sm:$0xff]  ;;  %v33_v13 = vadd.s32 768, %v690_v5 }
  0x90   :  { %576 = vmatprep.subr.mxu0 %v157_v15  ;;  %500 = vmatprep.mubr.msk.f32.mxu0 %vm44_vm6, %v666_v14  ;;  %v175_v15 = vld [vmem:[#allocation2 + $0x380] sm:$0xff] }
  0x91   :  { %404 = vmatprep.subr.mxu1 %v665_v3  ;;  %502 = vmatprep.mubr.msk.f32.mxu1 %vm188_vm5, %v495_v16  ;;  %vm45_vm8 = vcmp.eq.s32.totalorder %v33_v13, %v696_v10 }
  0x92   :  { %577 = vmatpush3.msra.mxu0 %v141_v17  ;;  %405 = vmatpush1.msra.mxu1 %v173_v18 }
  0x93   :  { %578 = vmatprep.subr.mxu0 %v156_v19  ;;  %406 = vmatprep.subr.mxu1 %v665_v3 }
  0x94   :  { %579 = vmatpush3.msra.mxu0 %v140_v20  ;;  %407 = vmatpush1.msra.mxu1 %v172_v21 }
  0x95   :  { %580 = vmatprep.subr.mxu0 %v155_v22  ;;  %408 = vmatprep.subr.mxu1 %v665_v3 }
  0x96   :  { %581 = vmatpush3.msra.mxu0 %v139_v23  ;;  %409 = vmatpush1.msra.mxu1 %v171_v24 }
  0x97   :  { %582 = vmatprep.subr.mxu0 %v154_v25  ;;  %410 = vmatprep.subr.mxu1 %v665_v3 }
  0x98   :  { %583 = vmatpush3.msra.mxu0 %v138_v26  ;;  %411 = vmatpush1.msra.mxu1 %v170_v27 }
  0x99   :  { %584 = vmatprep.subr.mxu0 %v153_v28  ;;  %412 = vmatprep.subr.mxu1 %v665_v3 }
  0x9a   :  { %585 = vmatpush3.msra.mxu0 %v137_v29  ;;  %413 = vmatpush1.msra.mxu1 %v169_v30 }
  0x9b   :  { %586 = vmatprep.subr.mxu0 %v152_v31  ;;  %414 = vmatprep.subr.mxu1 %v665_v3 }
  0x9c   :  { %587 = vmatpush3.msra.mxu0 %v136_v32  ;;  %415 = vmatpush1.msra.mxu1 %v168_v33 }
  0x9d   :  { %588 = vmatprep.subr.mxu0 %v151_v34  ;;  %416 = vmatprep.subr.mxu1 %v665_v3 }
  0x9e   :  { %589 = vmatpush3.msra.mxu0 %v135_v35  ;;  %417 = vmatpush1.msra.mxu1 %v167_v36 }
  0x9f   :  { %590 = vmatprep.subr.mxu0 %v150_v37  ;;  %418 = vmatprep.subr.mxu1 %v665_v3 }
  0xa0   :  { %591 = vmatpush3.msra.mxu0 %v134_v38  ;;  %419 = vmatpush1.msra.mxu1 %v166_v39 }
  0xa1   :  { %592 = vmatprep.subr.mxu0 %v149_v40  ;;  %420 = vmatprep.subr.mxu1 %v665_v3 }
  0xa2   :  { %593 = vmatpush3.msra.mxu0 %v133_v41  ;;  %421 = vmatpush1.msra.mxu1 %v165_v42 }
  0xa3   :  { %594 = vmatprep.subr.mxu0 %v148_v43  ;;  %422 = vmatprep.subr.mxu1 %v665_v3 }
  0xa4   :  { %595 = vmatpush3.msra.mxu0 %v132_v44  ;;  %423 = vmatpush1.msra.mxu1 %v164_v45 }
  0xa5   :  { %596 = vmatprep.subr.mxu0 %v147_v46  ;;  %424 = vmatprep.subr.mxu1 %v665_v3 }
  0xa6   :  { %597 = vmatpush3.msra.mxu0 %v131_v47  ;;  %425 = vmatpush1.msra.mxu1 %v163_v48 }
  0xa7   :  { %598 = vmatprep.subr.mxu0 %v146_v49  ;;  %426 = vmatprep.subr.mxu1 %v665_v3 }
  0xa8   :  { %599 = vmatpush3.msra.mxu0 %v130_v50  ;;  %427 = vmatpush1.msra.mxu1 %v162_v51 }
  0xa9   :  { %600 = vmatprep.subr.mxu0 %v145_v52  ;;  %428 = vmatprep.subr.mxu1 %v665_v3 }
  0xaa   :  { %601 = vmatpush3.msra.mxu0 %v129_v53  ;;  %429 = vmatpush1.msra.mxu1 %v161_v54 }
  0xab   :  { %602 = vmatprep.subr.mxu0 %v144_v55  ;;  %430 = vmatprep.subr.mxu1 %v665_v3 }
  0xac   :  { %603 = vmatpush3.msra.mxu0 %v128_v56  ;;  %431 = vmatpush1.msra.mxu1 %v160_v57 }
  0xad   :  { %604 = vmatprep.subr.mxu0 %v143_v58  ;;  %432 = vmatprep.subr.mxu1 %v665_v3 }
  0xae   :  { %605 = vmatpush3.msra.mxu0 %v127_v60  ;;  %433 = vmatpush1.msra.mxu1 %v159_v61 }
  0xaf   :  { %501 = vmatmul.mubr.msk.f32.vlgmr.msra.gmra.mxu0 %vm43_vm7, %v666_v14  ;;  %440 = vmatprep.subr.mxu1 %v665_v3 }
  0xb0   :  { %441 = vmatpush2.msra.mxu1 %v187_v62 }
  0xb1   :  { %442 = vmatprep.subr.mxu1 %v665_v3 }
  0xb2   :  { %443 = vmatpush2.msra.mxu1 %v186_v63 }
  0xb3   :  { %444 = vmatprep.subr.mxu1 %v665_v3 }
  0xb4   :  { %445 = vmatpush2.msra.mxu1 %v185_v0 }
  0xb5   :  { %446 = vmatprep.subr.mxu1 %v665_v3 }
  0xb6   :  { %447 = vmatpush2.msra.mxu1 %v184_v1 }
  0xb7   :  { %448 = vmatprep.subr.mxu1 %v665_v3 }
  0xb8   :  { %449 = vmatpush2.msra.mxu1 %v183_v2 }
  0xb9   :  { %450 = vmatprep.subr.mxu1 %v665_v3 }
  0xba   :  { %451 = vmatpush2.msra.mxu1 %v182_v4 }
  0xbb   :  { %452 = vmatprep.subr.mxu1 %v665_v3 }
  0xbc   :  { %453 = vmatpush2.msra.mxu1 %v181_v6 }
  0xbd   :  { %454 = vmatprep.subr.mxu1 %v665_v3 }
  0xbe   :  { %455 = vmatpush2.msra.mxu1 %v180_v7 }
  0xbf   :  { %456 = vmatprep.subr.mxu1 %v665_v3 }
  0xc0   :  { %457 = vmatpush2.msra.mxu1 %v179_v8 }
  0xc1   :  { %458 = vmatprep.subr.mxu1 %v665_v3 }
  0xc2   :  { %459 = vmatpush2.msra.mxu1 %v178_v9 }
  0xc3   :  { %460 = vmatprep.subr.mxu1 %v665_v3 }
  0xc4   :  { %461 = vmatpush2.msra.mxu1 %v177_v11 }
  0xc5   :  { %462 = vmatprep.subr.mxu1 %v665_v3 }
  0xc6   :  { %463 = vmatpush2.msra.mxu1 %v176_v12 }
  0xc7   :  { %464 = vmatprep.subr.mxu1 %v665_v3 }
  0xc8   :  { %465 = vmatpush2.msra.mxu1 %v175_v15 }
  0xc9   :  { %503 = vmatmul.mubr.msk.f32.vlgmr.msra.gmra.mxu1 %vm45_vm8, %v666_v14 }
 0x14e   :  { %v536_v16 = vpop.f32.mrf.mxu0  ;;  %v571_v17 = vpop.f32.mrf.mxu1 }
 0x150   :  { %v537_v18 = vpop.f32.mrf.mxu0  ;;  %v572_v20 = vpop.f32.mrf.mxu1 }
 0x151   :  { %v538_v22 = vadd.f32 %v537_v18, %v536_v16  ;;  %v573_v23 = vadd.f32 %v572_v20, %v571_v17 }
 0x153   :  { %v329_v24 = vadd.f32 %v573_v23, %v538_v22 }
 0x16f   :  { %v606_v19 = vpop.f32.mrf.mxu0 }
 0x171   :  { %v607_v21 = vpop.f32.mrf.mxu0 }
 0x172   :  { %v608_v5 = vadd.f32 %v607_v21, %v606_v19 }
 0x174   :  { %v399_v25 = vadd.f32 %v608_v5, %v329_v24 }
 0x189   :  { %v468_v26 = vpop.f32.mrf.mxu1 }
 0x18a   :  { %v469_v3 = vadd.f32 %v468_v26, %v399_v25 }
 0x18b   :  { %v470_v27 = vpop.f32.mrf.mxu1 }
 0x18c   :  { %472 = vst [vmem:[#allocation5] sm:$0xff] %v469_v3 }
 0x18d   :  { %648 = shalt.err (!%p645_p9)
}
 0x18e   :  { %482 = dma.vmem_to_hbm [thread:$0]  %s480_s1, 128, %s751_s2, [#allocation4]  }
 0x18f   :  { %659 = dma.done.wait [#allocation4], 128  }
 0x190   :  { %660 = vsyncadd [#allocation4], 4294967168 }
 0x191   :  { %486 = vsyncpa [#allocation3], 1 }
 0x192   :  { %487 = vsyncpa [#allocation4], 1 }

</bundles_post_ra>
